<compile_context>
chip_gen: v6e
topology: v6e:2x2x1
jax: 0.10.0
libtpu: 0.0.40
codegen_flags: <defaults>
</compile_context>

<pallas_src>
import functools

import jax
import jax.numpy as jnp
from jax.experimental import pallas as pl
from jax.experimental.pallas import tpu as pltpu


def _round_up(x, m):
    return ((x + m - 1) // m) * m


# ---------------------------------------------------------------------------
# Kernel body: the whole MLP (L x [Linear (+SiLU)]) fused in one pallas_call.
# ---------------------------------------------------------------------------
def _fused_mlp_kernel(x_ref, *refs, num_layers):
    """refs = (w0, b0, w1, b1, ..., w_{L-1}, b_{L-1}, o_ref)

    x_ref : (tm, d0p)        bf16
    w_l   : (d_lp, d_{l+1}p) bf16  (zero-padded to 128-lane multiples)
    b_l   : (1, d_{l+1}p)    f32   (zero-padded)
    o_ref : (tm, d_Lp)       out_dtype
    Activations stay resident in VMEM/vregs across layers.
    """
    o_ref = refs[-1]
    wb = refs[:-1]

    h = x_ref[...]                                                 # bf16
    acc = None
    for l in range(num_layers):
        w_ref = wb[2 * l]
        b_ref = wb[2 * l + 1]
        # bf16 x bf16 -> f32 accumulation on the MXU.
        acc = jnp.dot(h, w_ref[...], preferred_element_type=jnp.float32)
        acc = acc + b_ref[...]                                     # f32 bias
        if l != num_layers - 1:
            acc = acc * jax.nn.sigmoid(acc)                        # SiLU (EUP)
            h = acc.astype(jnp.bfloat16)
    o_ref[...] = acc.astype(o_ref.dtype)


# ---------------------------------------------------------------------------
# One-time parameter preparation (pad + cast). Cache and reuse across calls.
# ---------------------------------------------------------------------------
def prepare_params(params):
    """params: list of (w (d_in, d_out), b (1, d_out) or (d_out,)) f32 arrays,
    with the weight already transposed vs nn.Linear.weight so y = x @ w + b.

    Zero-padded weight columns/rows and zero bias lanes keep padded
    activations exactly SiLU(0)=0, so they cannot leak into valid lanes.
    """
    assert len(params) >= 1, "MLP requires num_layers >= 1"
    dims = [params[0][0].shape[0]] + [w.shape[1] for (w, _) in params]
    pdims = [_round_up(d, 128) for d in dims]

    weights, biases = [], []
    for l, (w, b) in enumerate(params):
        d_in, d_out = w.shape
        pin, pout = pdims[l], pdims[l + 1]
        wp = jnp.pad(w.astype(jnp.bfloat16),
                     ((0, pin - d_in), (0, pout - d_out)))
        bp = jnp.pad(jnp.reshape(b, (1, d_out)).astype(jnp.float32),
                     ((0, 0), (0, pout - d_out)))
        weights.append(wp)
        biases.append(bp)
    return {"weights": weights, "biases": biases, "dims": dims, "pdims": pdims}


def _select_tm(M, *, max_tm=512, min_steps=2):
    """Batch (sublane) tile:
      * multiple of 16 (bf16 packed sublane tile is (16,128); f32 needs 8),
      * >= min_steps grid steps when the batch allows, so the 'parallel' axis
        shards across the two TensorCores on v7x,
      * capped at max_tm and sized to minimize batch padding.
    """
    if M <= 16:
        return 16
    n_steps = max(min_steps, pl.cdiv(M, max_tm))
    return _round_up(pl.cdiv(M, n_steps), 16)


def _vmem_cap_bytes():
    try:
        return int(pltpu.get_tpu_info().vmem_capacity_bytes)
    except Exception:
        return 64 << 20          # conservative (v7x per-TC VMEM)


# ---------------------------------------------------------------------------
# Forward wrapper.
# ---------------------------------------------------------------------------
def mlp_forward(x, prepared, *, tm=None, out_dtype=jnp.float32):
    """x: (M, dim_in) f32. prepared: output of prepare_params()."""
    weights, biases = prepared["weights"], prepared["biases"]
    dims, pdims = prepared["dims"], prepared["pdims"]
    num_layers = len(weights)
    M, dim_in = x.shape
    assert dim_in == dims[0], f"expected dim_in={dims[0]}, got {dim_in}"
    dim_out = dims[-1]

    if tm is None:
        tm = _select_tm(M)
    Mp = _round_up(M, tm)
    grid_m = Mp // tm

    # Pad + cast the input once (single jnp.pad of the bf16 cast).
    xp = jnp.pad(x.astype(jnp.bfloat16),
                 ((0, Mp - M), (0, pdims[0] - dim_in)))

    # --- VMEM budget (weights single-buffered, I/O tiles double-buffered) ---
    out_itemsize = jnp.dtype(out_dtype).itemsize
    w_bytes = sum(int(w.size) * 2 for w in weights)
    b_bytes = sum(int(b.size) * 4 for b in biases)
    io_bytes = 2 * tm * pdims[0] * 2 + 2 * tm * pdims[-1] * out_itemsize
    tmp_bytes = 4 * tm * max(pdims) * 4          # f32 intermediates headroom
    budget = w_bytes + b_bytes + io_bytes + tmp_bytes
    vmem_limit = int(min(0.9 * _vmem_cap_bytes(),
                         max(32 << 20, budget + (4 << 20))))

    # --- specs ---------------------------------------------------------------
    resident = pl.Buffered(1)    # constant index_map -> no double buffering
    flat_inputs = [xp]
    in_specs = [pl.BlockSpec((tm, pdims[0]), lambda i: (i, 0))]
    for l in range(num_layers):
        pin, pout = pdims[l], pdims[l + 1]
        flat_inputs += [weights[l], biases[l]]
        in_specs += [
            pl.BlockSpec((pin, pout), lambda i: (0, 0), pipeline_mode=resident),
            pl.BlockSpec((1, pout), lambda i: (0, 0), pipeline_mode=resident),
        ]

    kernel = functools.partial(_fused_mlp_kernel, num_layers=num_layers)
    out_padded = pl.pallas_call(
        kernel,
        out_shape=jax.ShapeDtypeStruct((Mp, pdims[-1]), out_dtype),
        grid_spec=pltpu.PrefetchScalarGridSpec(
            num_scalar_prefetch=0,
            grid=(grid_m,),
            in_specs=in_specs,
            out_specs=pl.BlockSpec((tm, pdims[-1]), lambda i: (i, 0)),
        ),
        compiler_params=pltpu.CompilerParams(
            dimension_semantics=("parallel",),
            vmem_limit_bytes=vmem_limit),
    )(*flat_inputs)

    return out_padded[:M, :dim_out]


# ---------------------------------------------------------------------------
# Parameter init + references.
# ---------------------------------------------------------------------------
def init_mlp_params(key, dim_in, dim_out, dim_hidden, num_layers,
                    dtype=jnp.float32):
    """Deterministic parameter init (PyTorch-style uniform bounds)."""
    params = []
    for l in range(num_layers):
        d_in = dim_in if l == 0 else dim_hidden
        d_out = dim_out if l == num_layers - 1 else dim_hidden
        key, kw, kb = jax.random.split(key, 3)
        bound = 1.0 / (d_in ** 0.5)
        w = jax.random.uniform(kw, (d_in, d_out), dtype, -bound, bound)
        b = jax.random.uniform(kb, (1, d_out), dtype, -bound, bound)
        params.append((w, b))
    return params


def mlp_reference_f32(x, params):
    num_layers = len(params)
    for l, (w, b) in enumerate(params):
        x = x @ w + b
        if l != num_layers - 1:
            x = x * jax.nn.sigmoid(x)
    return x


def mlp_reference_bf16(x, params):
    """Reference mimicking the kernel's bf16-matmul / f32-accumulate path."""
    num_layers = len(params)
    h = x.astype(jnp.bfloat16)
    acc = None
    for l, (w, b) in enumerate(params):
        acc = jnp.dot(h, w.astype(jnp.bfloat16),
                      preferred_element_type=jnp.float32)
        acc = acc + b.astype(jnp.float32)
        if l != num_layers - 1:
            acc = acc * jax.nn.sigmoid(acc)
            h = acc.astype(jnp.bfloat16)
    return acc


if __name__ == "__main__":
    # Shapes implied by the module: MLP(dim_in=32, dim_out=16, dim_hidden=64,
    # num_layers=3).
    dim_in, dim_hidden, dim_out, num_layers = 32, 64, 16, 3

    key = jax.random.PRNGKey(0)
    kx, kx2, kp = jax.random.split(key, 3)
    params = init_mlp_params(kp, dim_in, dim_out, dim_hidden, num_layers)

    # One-time pad + cast of the parameters (cached across calls).
    prepared = prepare_params(params)
    mlp = jax.jit(lambda x: mlp_forward(x, prepared))

    # Case 1: small batch (single grid step).
    x = jax.random.normal(kx, (8, dim_in), jnp.float32)
    out = jax.block_until_ready(mlp(x))
    assert out.shape == (8, dim_out)
    assert jnp.allclose(out, mlp_reference_bf16(x, params), atol=5e-3, rtol=5e-3)
    assert jnp.allclose(out, mlp_reference_f32(x, params), atol=2e-2, rtol=2e-2)

    # Case 2: non-multiple batch -> tm=32, 2 grid steps (megacore sharding),
    # padded batch rows sliced off.
    x2 = jax.random.normal(kx2, (40, dim_in), jnp.float32)
    out2 = jax.block_until_ready(mlp(x2))
    assert out2.shape == (40, dim_out)
    assert jnp.allclose(out2, mlp_reference_bf16(x2, params), atol=5e-3, rtol=5e-3)
    assert jnp.allclose(out2, mlp_reference_f32(x2, params), atol=2e-2, rtol=2e-2)

    print("KERNEL_OK")
</pallas_src>

<mosaic_0001>
module attributes {stable_mosaic.version = 11 : i64} {
  func.func @_fused_mlp_kernel(%arg0: i32, %arg1: memref<16x128xbf16, #tpu.memory_space<vmem>>, %arg2: memref<128x128xbf16, #tpu.memory_space<vmem>>, %arg3: memref<1x128xf32, #tpu.memory_space<vmem>>, %arg4: memref<128x128xbf16, #tpu.memory_space<vmem>>, %arg5: memref<1x128xf32, #tpu.memory_space<vmem>>, %arg6: memref<128x128xbf16, #tpu.memory_space<vmem>>, %arg7: memref<1x128xf32, #tpu.memory_space<vmem>>, %arg8: memref<16x128xf32, #tpu.memory_space<vmem>>) attributes {dimension_semantics = [#tpu.dimension_semantics<parallel>], iteration_bounds = array<i64: 1>, scalar_prefetch = 0 : i64, scratch_operands = 0 : i64, tpu.core_type = #tpu.core_type<tc>, window_params = [{transform_indices = @transform_0, window_bounds = array<i64: 16, 128>}, {pipeline_mode = #tpu.pipeline_mode<synchronous>, transform_indices = @transform_1, window_bounds = array<i64: 128, 128>}, {pipeline_mode = #tpu.pipeline_mode<synchronous>, transform_indices = @transform_2, window_bounds = array<i64: 1, 128>}, {pipeline_mode = #tpu.pipeline_mode<synchronous>, transform_indices = @transform_3, window_bounds = array<i64: 128, 128>}, {pipeline_mode = #tpu.pipeline_mode<synchronous>, transform_indices = @transform_4, window_bounds = array<i64: 1, 128>}, {pipeline_mode = #tpu.pipeline_mode<synchronous>, transform_indices = @transform_5, window_bounds = array<i64: 128, 128>}, {pipeline_mode = #tpu.pipeline_mode<synchronous>, transform_indices = @transform_6, window_bounds = array<i64: 1, 128>}, {transform_indices = @transform_7, window_bounds = array<i64: 16, 128>}]} {
    %c0 = arith.constant 0 : index
    %c0_0 = arith.constant 0 : index
    %0 = vector.load %arg1[%c0, %c0_0] : memref<16x128xbf16, #tpu.memory_space<vmem>>, vector<16x128xbf16>
    %c0_1 = arith.constant 0 : index
    %c0_2 = arith.constant 0 : index
    %1 = vector.load %arg2[%c0_1, %c0_2] : memref<128x128xbf16, #tpu.memory_space<vmem>>, vector<128x128xbf16>
    %cst = arith.constant dense<0.000000e+00> : vector<16x128xf32>
    %2 = tpu.matmul %0, %1, %cst {dimension_numbers = #tpu.dot_dimension_numbers<[1], [0], [0], [1], [0, 0, 1, 1], [], []>} : vector<16x128xbf16>, vector<128x128xbf16>, vector<16x128xf32> -> vector<16x128xf32>
    %c0_3 = arith.constant 0 : index
    %c0_4 = arith.constant 0 : index
    %3 = vector.load %arg3[%c0_3, %c0_4] : memref<1x128xf32, #tpu.memory_space<vmem>>, vector<1x128xf32>
    %4 = vector.broadcast %3 : vector<1x128xf32> to vector<16x128xf32>
    %5 = arith.addf %2, %4 : vector<16x128xf32>
    %6 = arith.negf %5 : vector<16x128xf32>
    %7 = math.exp %6 : vector<16x128xf32>
    %cst_5 = arith.constant 1.000000e+00 : f32
    %8 = vector.broadcast %cst_5 : f32 to vector<16x128xf32>
    %9 = arith.addf %8, %7 : vector<16x128xf32>
    %10 = arith.divf %8, %9 : vector<16x128xf32>
    %11 = arith.mulf %5, %10 : vector<16x128xf32>
    %12 = arith.truncf %11 : vector<16x128xf32> to vector<16x128xbf16>
    %c0_6 = arith.constant 0 : index
    %c0_7 = arith.constant 0 : index
    %13 = vector.load %arg4[%c0_6, %c0_7] : memref<128x128xbf16, #tpu.memory_space<vmem>>, vector<128x128xbf16>
    %cst_8 = arith.constant dense<0.000000e+00> : vector<16x128xf32>
    %14 = tpu.matmul %12, %13, %cst_8 {dimension_numbers = #tpu.dot_dimension_numbers<[1], [0], [0], [1], [0, 0, 1, 1], [], []>} : vector<16x128xbf16>, vector<128x128xbf16>, vector<16x128xf32> -> vector<16x128xf32>
    %c0_9 = arith.constant 0 : index
    %c0_10 = arith.constant 0 : index
    %15 = vector.load %arg5[%c0_9, %c0_10] : memref<1x128xf32, #tpu.memory_space<vmem>>, vector<1x128xf32>
    %16 = vector.broadcast %15 : vector<1x128xf32> to vector<16x128xf32>
    %17 = arith.addf %14, %16 : vector<16x128xf32>
    %18 = arith.negf %17 : vector<16x128xf32>
    %19 = math.exp %18 : vector<16x128xf32>
    %cst_11 = arith.constant 1.000000e+00 : f32
    %20 = vector.broadcast %cst_11 : f32 to vector<16x128xf32>
    %21 = arith.addf %20, %19 : vector<16x128xf32>
    %22 = arith.divf %20, %21 : vector<16x128xf32>
    %23 = arith.mulf %17, %22 : vector<16x128xf32>
    %24 = arith.truncf %23 : vector<16x128xf32> to vector<16x128xbf16>
    %c0_12 = arith.constant 0 : index
    %c0_13 = arith.constant 0 : index
    %25 = vector.load %arg6[%c0_12, %c0_13] : memref<128x128xbf16, #tpu.memory_space<vmem>>, vector<128x128xbf16>
    %cst_14 = arith.constant dense<0.000000e+00> : vector<16x128xf32>
    %26 = tpu.matmul %24, %25, %cst_14 {dimension_numbers = #tpu.dot_dimension_numbers<[1], [0], [0], [1], [0, 0, 1, 1], [], []>} : vector<16x128xbf16>, vector<128x128xbf16>, vector<16x128xf32> -> vector<16x128xf32>
    %c0_15 = arith.constant 0 : index
    %c0_16 = arith.constant 0 : index
    %27 = vector.load %arg7[%c0_15, %c0_16] : memref<1x128xf32, #tpu.memory_space<vmem>>, vector<1x128xf32>
    %28 = vector.broadcast %27 : vector<1x128xf32> to vector<16x128xf32>
    %29 = arith.addf %26, %28 : vector<16x128xf32>
    %c0_17 = arith.constant 0 : index
    %c0_18 = arith.constant 0 : index
    %30 = vector.load %arg8[%c0_17, %c0_18] : memref<16x128xf32, #tpu.memory_space<vmem>>, vector<16x128xf32>
    tpu.vector_store %arg8[%c0_17, %c0_18], %29 {strides = array<i32>} : memref<16x128xf32, #tpu.memory_space<vmem>>, vector<16x128xf32>,
    return
  }
  func.func @transform_0(%arg0: i32) -> (i32, i32) {
    %c0_i32 = arith.constant 0 : i32
    %c0_i32_0 = arith.constant 0 : i32
    return %arg0, %c0_i32 : i32, i32
  }
  func.func @transform_1(%arg0: i32) -> (i32, i32) {
    %c0_i32 = arith.constant 0 : i32
    %c0_i32_0 = arith.constant 0 : i32
    %c0_i32_1 = arith.constant 0 : i32
    return %c0_i32, %c0_i32_0 : i32, i32
  }
  func.func @transform_2(%arg0: i32) -> (i32, i32) {
    %c0_i32 = arith.constant 0 : i32
    %c0_i32_0 = arith.constant 0 : i32
    %c0_i32_1 = arith.constant 0 : i32
    return %c0_i32, %c0_i32_0 : i32, i32
  }
  func.func @transform_3(%arg0: i32) -> (i32, i32) {
    %c0_i32 = arith.constant 0 : i32
    %c0_i32_0 = arith.constant 0 : i32
    %c0_i32_1 = arith.constant 0 : i32
    return %c0_i32, %c0_i32_0 : i32, i32
  }
  func.func @transform_4(%arg0: i32) -> (i32, i32) {
    %c0_i32 = arith.constant 0 : i32
    %c0_i32_0 = arith.constant 0 : i32
    %c0_i32_1 = arith.constant 0 : i32
    return %c0_i32, %c0_i32_0 : i32, i32
  }
  func.func @transform_5(%arg0: i32) -> (i32, i32) {
    %c0_i32 = arith.constant 0 : i32
    %c0_i32_0 = arith.constant 0 : i32
    %c0_i32_1 = arith.constant 0 : i32
    return %c0_i32, %c0_i32_0 : i32, i32
  }
  func.func @transform_6(%arg0: i32) -> (i32, i32) {
    %c0_i32 = arith.constant 0 : i32
    %c0_i32_0 = arith.constant 0 : i32
    %c0_i32_1 = arith.constant 0 : i32
    return %c0_i32, %c0_i32_0 : i32, i32
  }
  func.func @transform_7(%arg0: i32) -> (i32, i32) {
    %c0_i32 = arith.constant 0 : i32
    %c0_i32_0 = arith.constant 0 : i32
    return %arg0, %c0_i32 : i32, i32
  }
}

</mosaic_0001>

<bundles_post_ra>
// kernel: _lambda_.1
= control target key start
LH: loop header
LB: loop body
LE: loop exit
PB: predicated region body
PF: predicated region fallthrough
CT: control target
= control target key end

     0   :  { %12 = vsyncpa [#allocation3], 0  ;;  %s785_s0 = inlined_call_operand.vmem [shape: bf16[16,128], index: 0, kind: input, shape index: {}]   ;;  %s786_s1 = inlined_call_operand.hbm [shape: bf16[128,128], index: 1, kind: input, shape index: {}]   ;;  %s787_s2 = inlined_call_operand.vmem [shape: f32[1,128], index: 2, kind: input, shape index: {}]   ;;  %s788_s3 = inlined_call_operand.hbm [shape: bf16[128,128], index: 3, kind: input, shape index: {}]   ;;  %s789_s4 = inlined_call_operand.vmem [shape: f32[1,128], index: 4, kind: input, shape index: {}]   ;;  %s790_s5 = inlined_call_operand.hbm [shape: bf16[128,128], index: 5, kind: input, shape index: {}]   ;;  %s791_s6 = inlined_call_operand.vmem [shape: f32[1,128], index: 6, kind: input, shape index: {}]   ;;  %s792_s7 = inlined_call_operand.vmem [shape: f32[16,128], index: 7, kind: output, shape index: {}]  }
   0x1   :  { %13 = vsyncpa [#allocation5], 0  ;;  %s681_s24 = smov [#allocation4]   ;;  %s682_s26 = smov [#allocation2]  }
   0x2   :  { %s35_s25 = sshll.u32 %s681_s24, 4  ;;  %s21_s27 = sshll.u32 %s682_s26, 4  ;;  %s36_s25 = int_to_ptr.vmem [resolvable:$true] %s35_s25  ;;  %s22_s27 = int_to_ptr.vmem [resolvable:$true] %s21_s27 }
   0x3   :  { %s625_s28 = scalar_lea.vmem %s36_s25, 1024  ;;  %p630_p1 = scmp.lt.s32.totalorder %s36_s25, %s36_s25 }
   0x4   :  { %p626_p0 = scmp.ne.s32.totalorder %s36_s25, %s625_s28  ;;  %p631_p2 = scmp.lt.s32.totalorder %s625_s28, %s625_s28 }
   0x6   :  { %p632_p3 = por %p631_p2, %p630_p1 }
   0x8   :  { %p633_p4 = pnand %p632_p3, %p626_p0 }
   0xa   :  { %636 = shalt.err (!%p633_p4)
}
   0xb   :  { %s683_s29 = smov 64   ;;  %s684_s30 = smov 4  }
   0xc   :  { %41 = dma.hbm_to_vmem [thread:$0]  %s788_s3, 1024, %s36_s25, [#allocation5], %s683_s29, %s683_s29, %s684_s30  }
   0xd   :  { %s645_s10 = scalar_lea.vmem %s22_s27, 1024  ;;  %p650_p6 = scmp.lt.s32.totalorder %s22_s27, %s22_s27 }
   0xe   :  { %p646_p5 = scmp.ne.s32.totalorder %s22_s27, %s645_s10  ;;  %p651_p7 = scmp.lt.s32.totalorder %s645_s10, %s645_s10 }
  0x10   :  { %p652_p8 = por %p651_p7, %p650_p6 }
  0x12   :  { %p653_p9 = pnand %p652_p8, %p646_p5 }
  0x14   :  { %656 = shalt.err (!%p653_p9)
}
  0x15   :  { %27 = dma.hbm_to_vmem [thread:$0]  %s786_s1, 1024, %s22_s27, [#allocation3], %s683_s29, %s683_s29, %s684_s30  }
  0x16   :  { %s685_s13 = smov [#allocation6]  }
  0x17   :  { %s49_s14 = sshll.u32 %s685_s13, 4  ;;  %s50_s14 = int_to_ptr.vmem [resolvable:$true] %s49_s14 }
  0x18   :  { %s665_s15 = scalar_lea.vmem %s50_s14, 1024  ;;  %p670_p11 = scmp.lt.s32.totalorder %s50_s14, %s50_s14 }
  0x19   :  { %p666_p10 = scmp.ne.s32.totalorder %s50_s14, %s665_s15  ;;  %p671_p12 = scmp.lt.s32.totalorder %s665_s15, %s665_s15 }
  0x1b   :  { %p672_p13 = por %p671_p12, %p670_p11 }
  0x1d   :  { %p673_p0 = pnand %p672_p13, %p666_p10 }
  0x1f   :  { %676 = shalt.err (!%p673_p0)
}
  0x20   :  { %55 = dma.hbm_to_vmem [thread:$0]  %s790_s5, 1024, %s50_s14, [#allocation5], %s683_s29, %s683_s29, %s684_s30  }
  0x21   :  { %677 = dma.done.wait [#allocation3], 1024  }
  0x22   :  { %678 = vsyncadd [#allocation3], 4294966272 }
  0x23   :  { %679 = dma.done.wait [#allocation5], 2048  }
  0x24   :  { %680 = vsyncadd [#allocation5], 4294965248  ;;  %v686_v0 = vmov 0.0   ;;  %vm687_vm0 = vmmov 0   ;;  %v576_v1 = vld [vmem:[#allocation2 + $0x38] sm:$0xff]   ;;  %v577_v2 = vld [vmem:[#allocation2 + $0x30] sm:$0xff]  }
  0x25   :  { %509 = vmatprep.subr.bf16.mxu0 %v686_v0  ;;  %525 = vmatprep.mubr.msk.bf16.mxu0 %vm687_vm0, %v686_v0  ;;  %v578_v3 = vld [vmem:[#allocation2 + $0x28] sm:$0xff]   ;;  %v579_v4 = vld [vmem:[#allocation2 + $0x20] sm:$0xff]   ;;  %v580_v5 = vld [vmem:[#allocation2 + $0x18] sm:$0xff]  }
  0x26   :  { %529 = vmatprep.subr.bf16.mxu1 %v686_v0  ;;  %545 = vmatprep.mubr.msk.bf16.mxu1 %vm687_vm0, %v686_v0  ;;  %v581_v6 = vld [vmem:[#allocation2 + $0x10] sm:$0xff]   ;;  %v582_v7 = vld [vmem:[#allocation2 + $0x8] sm:$0xff]   ;;  %v583_v8 = vld [vmem:[#allocation2] sm:$0xff]  }
  0x27   :  { %510 = vmatpush3.bf16.msra.mxu0 %v576_v1  ;;  %v584_v9 = vld [vmem:[%s785_s0] sm:$0xff]   ;;  %v585_v10 = vld [vmem:[#allocation4 + $0x38] sm:$0xff]   ;;  %v586_v11 = vld [vmem:[#allocation4 + $0x30] sm:$0xff]  }
  0x28   :  { %511 = vmatprep.subr.bf16.mxu0 %v686_v0  ;;  %530 = vmatpush3.bf16.msra.mxu1 %v585_v10  ;;  %v587_v12 = vld [vmem:[#allocation4 + $0x28] sm:$0xff]   ;;  %v588_v13 = vld [vmem:[#allocation4 + $0x20] sm:$0xff]   ;;  %v589_v14 = vld [vmem:[#allocation4 + $0x18] sm:$0xff]  }
  0x29   :  { %531 = vmatprep.subr.bf16.mxu1 %v686_v0  ;;  %v590_v15 = vld [vmem:[#allocation4 + $0x10] sm:$0xff]   ;;  %v591_v16 = vld [vmem:[#allocation4 + $0x8] sm:$0xff]   ;;  %v592_v17 = vld [vmem:[#allocation4] sm:$0xff]  }
  0x2a   :  { %v450_v18 = vld [vmem:[%s787_s2] ss:$0 sm:$0xff]  ;;  %v593_v36 = vld [vmem:[#allocation6 + $0x38] sm:$0xff]   ;;  %v594_v37 = vld [vmem:[#allocation6 + $0x30] sm:$0xff]  }
  0x2b   :  { %512 = vmatpush3.bf16.msra.mxu0 %v577_v2  ;;  %v595_v38 = vld [vmem:[#allocation6 + $0x28] sm:$0xff]   ;;  %v596_v39 = vld [vmem:[#allocation6 + $0x20] sm:$0xff]   ;;  %v597_v40 = vld [vmem:[#allocation6 + $0x18] sm:$0xff]  }
  0x2c   :  { %513 = vmatprep.subr.bf16.mxu0 %v686_v0  ;;  %532 = vmatpush3.bf16.msra.mxu1 %v586_v11  ;;  %v598_v41 = vld [vmem:[#allocation6 + $0x10] sm:$0xff]   ;;  %v599_v42 = vld [vmem:[#allocation6 + $0x8] sm:$0xff]   ;;  %v600_v43 = vld [vmem:[#allocation6] sm:$0xff]  }
  0x2d   :  { %533 = vmatprep.subr.bf16.mxu1 %v686_v0  ;;  %v462_v44 = vld [vmem:[%s789_s4] ss:$0 sm:$0xff] }
  0x2e   :  { %v473_v62 = vld [vmem:[%s791_s6] ss:$0 sm:$0xff] }
  0x2f   :  { %514 = vmatpush3.bf16.msra.mxu0 %v578_v3 }
  0x30   :  { %515 = vmatprep.subr.bf16.mxu0 %v686_v0  ;;  %534 = vmatpush3.bf16.msra.mxu1 %v587_v12 }
  0x31   :  { %535 = vmatprep.subr.bf16.mxu1 %v686_v0 }
  0x33   :  { %516 = vmatpush3.bf16.msra.mxu0 %v579_v4 }
  0x34   :  { %517 = vmatprep.subr.bf16.mxu0 %v686_v0  ;;  %536 = vmatpush3.bf16.msra.mxu1 %v588_v13 }
  0x35   :  { %537 = vmatprep.subr.bf16.mxu1 %v686_v0 }
  0x37   :  { %518 = vmatpush3.bf16.msra.mxu0 %v580_v5 }
  0x38   :  { %519 = vmatprep.subr.bf16.mxu0 %v686_v0  ;;  %538 = vmatpush3.bf16.msra.mxu1 %v589_v14 }
  0x39   :  { %539 = vmatprep.subr.bf16.mxu1 %v686_v0 }
  0x3b   :  { %520 = vmatpush3.bf16.msra.mxu0 %v581_v6 }
  0x3c   :  { %521 = vmatprep.subr.bf16.mxu0 %v686_v0  ;;  %540 = vmatpush3.bf16.msra.mxu1 %v590_v15 }
  0x3d   :  { %541 = vmatprep.subr.bf16.mxu1 %v686_v0 }
  0x3f   :  { %522 = vmatpush3.bf16.msra.mxu0 %v582_v7 }
  0x40   :  { %523 = vmatprep.subr.bf16.mxu0 %v686_v0  ;;  %542 = vmatpush3.bf16.msra.mxu1 %v591_v16 }
  0x41   :  { %543 = vmatprep.subr.bf16.mxu1 %v686_v0 }
  0x43   :  { %524 = vmatpush3.bf16.msra.mxu0 %v583_v8 }
  0x44   :  { %549 = vmatprep.subr.bf16.mxu0 %v686_v0  ;;  %544 = vmatpush3.bf16.msra.mxu1 %v592_v17 }
  0x46   :  { %526 = vmatmul.mubr.bf16.vlgmr.msra.gmra.mxu0 %v584_v9 }
  0x47   :  { %565 = vmatprep.mubr.msk.bf16.mxu0 %vm687_vm0, %v686_v0  ;;  %550 = vmatpush3.bf16.msra.mxu0 %v593_v36 }
  0x48   :  { %551 = vmatprep.subr.bf16.mxu0 %v686_v0 }
  0x4b   :  { %552 = vmatpush3.bf16.msra.mxu0 %v594_v37 }
  0x4c   :  { %553 = vmatprep.subr.bf16.mxu0 %v686_v0 }
  0x4f   :  { %554 = vmatpush3.bf16.msra.mxu0 %v595_v38 }
  0x50   :  { %555 = vmatprep.subr.bf16.mxu0 %v686_v0 }
  0x53   :  { %556 = vmatpush3.bf16.msra.mxu0 %v596_v39 }
  0x54   :  { %557 = vmatprep.subr.bf16.mxu0 %v686_v0 }
  0x57   :  { %558 = vmatpush3.bf16.msra.mxu0 %v597_v40 }
  0x58   :  { %559 = vmatprep.subr.bf16.mxu0 %v686_v0 }
  0x5b   :  { %560 = vmatpush3.bf16.msra.mxu0 %v598_v41 }
  0x5c   :  { %561 = vmatprep.subr.bf16.mxu0 %v686_v0 }
  0x5f   :  { %562 = vmatpush3.bf16.msra.mxu0 %v599_v42 }
  0x60   :  { %563 = vmatprep.subr.bf16.mxu0 %v686_v0 }
  0x63   :  { %564 = vmatpush3.bf16.msra.mxu0 %v600_v43 }
 0x106   :  { %v181_v19 = vpop.f32.mrf.mxu0 }
 0x107   :  { %v182_v20 = vadd.f32 %v450_v18, %v181_v19 }
 0x108   :  { %v527_v21 = vpop.f32.mrf.mxu0 }
 0x109   :  { %v460_v22 = vmul.f32 -1.442695, %v182_v20 }
 0x10a   :  { %v184_v23 = vpop.f32.mrf.mxu0 }
 0x10b   :  { %601 = vpow2.f32 %v460_v22  ;;  %v185_v24 = vadd.f32 %v450_v18, %v184_v23 }
 0x10c   :  { %v528_v25 = vpop.f32.mrf.mxu0 }
 0x10d   :  { %v461_v26 = vmul.f32 -1.442695, %v185_v24 }
 0x10f   :  { %603 = vpow2.f32 %v461_v26 }
 0x118   :  { %v602_v27 = vpop.eup %601 }
 0x119   :  { %v194_v28 = vadd.f32 1.0, %v602_v27 }
 0x11b   :  { %605 = vrcp.f32 %v194_v28 }
 0x11c   :  { %v604_v29 = vpop.eup %603 }
 0x11d   :  { %v195_v30 = vadd.f32 1.0, %v604_v29 }
 0x11f   :  { %607 = vrcp.f32 %v195_v30 }
 0x128   :  { %v606_v31 = vpop.eup %605 }
 0x129   :  { %v200_v33 = vmul.f32 %v606_v31, %v182_v20 }
 0x12c   :  { %v608_v32 = vpop.eup %607 }
 0x12d   :  { %v201_v34 = vmul.f32 %v608_v32, %v185_v24 }
 0x12f   :  { %v202_v35 = vpack.c.bf16 %v201_v34, %v200_v33 }
 0x131   :  { %546 = vmatmul.mubr.bf16.vlgmr.msra.gmra.mxu1 %v202_v35 }
 0x1f1   :  { %v308_v45 = vpop.f32.mrf.mxu1 }
 0x1f2   :  { %v309_v46 = vadd.f32 %v462_v44, %v308_v45 }
 0x1f3   :  { %v547_v47 = vpop.f32.mrf.mxu1 }
 0x1f4   :  { %v471_v48 = vmul.f32 -1.442695, %v309_v46 }
 0x1f5   :  { %v311_v49 = vpop.f32.mrf.mxu1 }
 0x1f6   :  { %609 = vpow2.f32 %v471_v48  ;;  %v312_v50 = vadd.f32 %v462_v44, %v311_v49 }
 0x1f7   :  { %v548_v51 = vpop.f32.mrf.mxu1 }
 0x1f8   :  { %v472_v52 = vmul.f32 -1.442695, %v312_v50 }
 0x1fa   :  { %611 = vpow2.f32 %v472_v52 }
 0x203   :  { %v610_v53 = vpop.eup %609 }
 0x204   :  { %v321_v54 = vadd.f32 1.0, %v610_v53 }
 0x206   :  { %613 = vrcp.f32 %v321_v54 }
 0x207   :  { %v612_v55 = vpop.eup %611 }
 0x208   :  { %v322_v56 = vadd.f32 1.0, %v612_v55 }
 0x20a   :  { %615 = vrcp.f32 %v322_v56 }
 0x213   :  { %v614_v57 = vpop.eup %613 }
 0x214   :  { %v327_v59 = vmul.f32 %v614_v57, %v309_v46 }
 0x217   :  { %v616_v58 = vpop.eup %615 }
 0x218   :  { %v328_v60 = vmul.f32 %v616_v58, %v312_v50 }
 0x21a   :  { %v329_v61 = vpack.c.bf16 %v328_v60, %v327_v59 }
 0x21c   :  { %566 = vmatmul.mubr.bf16.vlgmr.msra.gmra.mxu0 %v329_v61 }
 0x2dc   :  { %v435_v63 = vpop.f32.mrf.mxu0 }
 0x2dd   :  { %v436_v0 = vadd.f32 %v473_v62, %v435_v63 }
 0x2de   :  { %v567_v1 = vpop.f32.mrf.mxu0 }
 0x2df   :  { %442 = vst [vmem:[%s792_s7] sm:$0xff] %v436_v0 }
 0x2e0   :  { %v438_v2 = vpop.f32.mrf.mxu0 }
 0x2e1   :  { %v439_v3 = vadd.f32 %v473_v62, %v438_v2 }
 0x2e2   :  { %v568_v4 = vpop.f32.mrf.mxu0 }
 0x2e3   :  { %443 = vst [vmem:[%s792_s7 + $0x8] sm:$0xff] %v439_v3 }
 0x2e4   :  { %448 = vsyncpa [#allocation3], 1 }
 0x2e5   :  { %449 = vsyncpa [#allocation5], 1 }

</bundles_post_ra>
